<compile_context>
chip_gen: v5e
topology: v5e:2x2
jax: 0.10.0
libtpu: 0.0.40
codegen_flags: <defaults>
</compile_context>

<pallas_src>
import jax
import jax.numpy as jnp
from jax.experimental import pallas as pl
from jax.experimental.pallas import tpu as pltpu


# JPEG-standard YCbCr -> RGB coefficients (identical to the PyTorch module).
_CR_R = 1.402
_CB_G = -0.344136
_CR_G = -0.714136
_CB_B = 1.772
# -128 chroma shift folded into per-channel biases; exactly matches the
# reference (image + shift) @ matrix formulation in float32.
_BIAS_R = -128.0 * _CR_R                 # -179.456
_BIAS_G = -128.0 * (_CB_G + _CR_G)       # +135.458816
_BIAS_B = -128.0 * _CB_B                 # -226.816


def _ycbcr2rgb_kernel(img_ref, out_ref, tr_ref):
    """One (1, tH, 3*tW) interleaved tile -> one (1, 3, tH, tW) planar tile.

    img_ref : (1, tH, 3*tW) f32 lane-dense interleaved [Y0 Cb0 Cr0 Y1 Cb1 ...]
    out_ref : (1, 3, tH, tW) f32 planar RGB (lane-dense along tW)
    tr_ref  : (3*tW, tH)     f32 VMEM scratch, interleaved axis on sublanes
    """
    tw3 = img_ref.shape[2]
    tw = tw3 // 3

    # Put the channel-interleaved axis on sublanes; the channel split then
    # becomes sublane-strided vector loads (hardware-supported) instead of
    # lane-strided gathers.
    tr_ref[...] = img_ref[0].T                        # (3*tW, tH)

    y_t = tr_ref[pl.ds(0, tw, stride=3), :]           # (tW, tH)
    cb_t = tr_ref[pl.ds(1, tw, stride=3), :]          # (tW, tH)
    cr_t = tr_ref[pl.ds(2, tw, stride=3), :]          # (tW, tH)

    # JPEG YCbCr -> RGB with the -128 shift folded into the biases.
    r_t = y_t + _CR_R * cr_t + _BIAS_R
    g_t = y_t + _CB_G * cb_t + _CR_G * cr_t + _BIAS_G
    b_t = y_t + _CB_B * cb_t + _BIAS_B

    # Transpose back to (tH, tW) and store each plane lane-dense.
    out_ref[0, 0, :, :] = r_t.T
    out_ref[0, 1, :, :] = g_t.T
    out_ref[0, 2, :, :] = b_t.T


def _vmem_budgets():
    """Generation-aware (tile_budget_bytes, vmem_limit_bytes)."""
    try:
        cap = int(pltpu.get_tpu_info().vmem_capacity_bytes)
    except Exception:
        cap = 64 * 1024 * 1024        # conservative fallback (v7x per-TC VMEM)
    # Pallas-managed footprint target (in/out double buffers + scratch):
    #   ~51 MiB on 128 MiB parts (v5e/v6e), ~38 MiB on 64 MiB v7x.
    tile_budget = min(int(cap * 0.6), 56 * 1024 * 1024)
    # Scoped-VMEM limit raised past the 16/32 MiB defaults, with headroom for
    # intermediates / spills.
    vmem_limit = min(int(cap * 0.85), 100 * 1024 * 1024)
    return tile_budget, vmem_limit


def _pick_tiles(b: int, h: int, w: int, tile_budget_bytes: int):
    """Pick (tH, tW): lane-aligned tiles sized for the per-generation budget."""
    # --- width tile: keep output plane stores lane-dense (multiple of 128,
    # 3*tW stays lane-aligned since 3*128 = 384); fall back to full-W (exempt
    # from the (8,128) rule) for small unaligned widths.
    if w % 128 == 0:
        tw = min(w, 512)
    elif w <= 512:
        tw = w
    else:
        tw = 512

    # --- height tile: tH is the LANE dim of all transposed-domain work, so
    # prefer multiples of 128.  ~72 B per (row, width-elem) covers the 2x in +
    # 2x out double buffers + transpose scratch + intermediate headroom.
    per_row = 72 * tw
    max_th = max(8, tile_budget_bytes // per_row)
    th = h if h <= max_th else max_th
    if th < h:
        if th >= 128:
            th = (th // 128) * 128
        else:
            th = max(8, (th // 8) * 8)

    # --- v7x megacore: with batch == 1 make sure the parallel grid has at
    # least two height steps so both TensorCores get work.
    if b == 1 and th >= h and h > 128:
        half = -(-h // 2)
        th = max(128, (half // 128) * 128) if half >= 128 else half
        if th < h and th % 8 != 0:
            th = max(8, (th // 8) * 8)

    return min(th, h), tw


@jax.jit
def ycbcr2rgb_jpeg(image: jax.Array) -> jax.Array:
    """Pallas equivalent of YCbCr2RGBJpeg.forward.

    Args:
        image: (B, H, W, 3) YCbCr image (values in [0, 255]).
    Returns:
        (B, 3, H, W) float32 RGB image.
    """
    assert image.ndim == 4 and image.shape[-1] == 3
    b, h, w, _ = image.shape
    image = image.astype(jnp.float32)

    tile_budget, vmem_limit = _vmem_budgets()
    th, tw = _pick_tiles(b, h, w, tile_budget)

    # Free, byte-identical view with a lane-dense minor dim.
    img2 = image.reshape(b, h, 3 * w)

    grid = (b, pl.cdiv(h, th), pl.cdiv(w, tw))

    return pl.pallas_call(
        _ycbcr2rgb_kernel,
        out_shape=jax.ShapeDtypeStruct((b, 3, h, w), jnp.float32),
        grid=grid,
        in_specs=[pl.BlockSpec((1, th, 3 * tw), lambda bi, hi, wi: (bi, hi, wi))],
        out_specs=pl.BlockSpec((1, 3, th, tw), lambda bi, hi, wi: (bi, 0, hi, wi)),
        scratch_shapes=[pltpu.VMEM((3 * tw, th), jnp.float32)],
        compiler_params=pltpu.CompilerParams(
            dimension_semantics=("parallel", "parallel", "parallel"),
            vmem_limit_bytes=vmem_limit),
        cost_estimate=pl.CostEstimate(
            flops=10 * b * h * w,
            transcendentals=0,
            bytes_accessed=24 * b * h * w),   # 12 B/pixel read + 12 B/pixel write
    )(img2)


def _reference(image: jax.Array) -> jax.Array:
    """Pure-JAX reference mirroring the PyTorch forward."""
    shift = jnp.array([0.0, -128.0, -128.0], jnp.float32)
    matrix = jnp.array(
        [[1.0, 0.0, 1.402],
         [1.0, -0.344136, -0.714136],
         [1.0, 1.772, 0.0]], dtype=jnp.float32).T
    result = jnp.tensordot(image.astype(jnp.float32) + shift, matrix, axes=1)
    return jnp.transpose(result, (0, 3, 1, 2))


if __name__ == "__main__":
    key = jax.random.PRNGKey(0)
    # Small, lane-aligned demo shape (W multiple of 128 keeps every load/store
    # unmasked); arbitrary B/H/W are also supported via the cdiv grid.
    B, H, W = 2, 128, 128
    x = jax.random.uniform(key, (B, H, W, 3), dtype=jnp.float32) * 255.0

    out = jax.block_until_ready(ycbcr2rgb_jpeg(x))
    ref = _reference(x)

    assert out.shape == (B, 3, H, W), out.shape
    max_err = float(jnp.max(jnp.abs(out - ref)))
    assert jnp.allclose(out, ref, atol=1e-2, rtol=1e-5), max_err

    print("KERNEL_OK")
</pallas_src>

<mosaic_0001>
module attributes {stable_mosaic.version = 11 : i64} {
  func.func @_ycbcr2rgb_kernel(%arg0: i32, %arg1: i32, %arg2: i32, %arg3: memref<1x128x384xf32, #tpu.memory_space<vmem>>, %arg4: memref<1x3x128x128xf32, #tpu.memory_space<vmem>>, %arg5: memref<384x128xf32, #tpu.memory_space<vmem>>) attributes {dimension_semantics = [#tpu.dimension_semantics<parallel>, #tpu.dimension_semantics<parallel>, #tpu.dimension_semantics<parallel>], iteration_bounds = array<i64: 2, 1, 1>, scalar_prefetch = 0 : i64, scratch_operands = 1 : i64, tpu.core_type = #tpu.core_type<tc>, window_params = [{transform_indices = @transform_0, window_bounds = array<i64: 1, 128, 384>}, {transform_indices = @transform_1, window_bounds = array<i64: 1, 3, 128, 128>}]} {
    %c0 = arith.constant 0 : index
    %c0_0 = arith.constant 0 : index
    %c0_1 = arith.constant 0 : index
    %0 = vector.load %arg3[%c0, %c0_0, %c0_1] : memref<1x128x384xf32, #tpu.memory_space<vmem>>, vector<1x128x384xf32>
    %1 = vector.shape_cast %0 : vector<1x128x384xf32> to vector<128x384xf32>
    %2 = tpu.transpose %1, [1, 0] : vector<128x384xf32> -> vector<384x128xf32>
    %c0_2 = arith.constant 0 : index
    %c0_3 = arith.constant 0 : index
    %3 = vector.load %arg5[%c0_2, %c0_3] : memref<384x128xf32, #tpu.memory_space<vmem>>, vector<384x128xf32>
    tpu.vector_store %arg5[%c0_2, %c0_3], %2 {strides = array<i32>} : memref<384x128xf32, #tpu.memory_space<vmem>>, vector<384x128xf32>,
    %c0_4 = arith.constant 0 : index
    %c0_5 = arith.constant 0 : index
    %4 = tpu.strided_load %arg5[%c0_4, %c0_5] {strides = array<i32: 3, 1>} : memref<384x128xf32, #tpu.memory_space<vmem>>, vector<128x128xf32>
    %c1 = arith.constant 1 : index
    %c0_6 = arith.constant 0 : index
    %5 = tpu.strided_load %arg5[%c1, %c0_6] {strides = array<i32: 3, 1>} : memref<384x128xf32, #tpu.memory_space<vmem>>, vector<128x128xf32>
    %c2 = arith.constant 2 : index
    %c0_7 = arith.constant 0 : index
    %6 = tpu.strided_load %arg5[%c2, %c0_7] {strides = array<i32: 3, 1>} : memref<384x128xf32, #tpu.memory_space<vmem>>, vector<128x128xf32>
    %cst = arith.constant 1.402000e+00 : f32
    %7 = vector.broadcast %cst : f32 to vector<128x128xf32>
    %8 = arith.mulf %7, %6 : vector<128x128xf32>
    %9 = arith.addf %4, %8 : vector<128x128xf32>
    %cst_8 = arith.constant -1.794560e+02 : f32
    %10 = vector.broadcast %cst_8 : f32 to vector<128x128xf32>
    %11 = arith.addf %9, %10 : vector<128x128xf32>
    %cst_9 = arith.constant -3.441360e-01 : f32
    %12 = vector.broadcast %cst_9 : f32 to vector<128x128xf32>
    %13 = arith.mulf %12, %5 : vector<128x128xf32>
    %14 = arith.addf %4, %13 : vector<128x128xf32>
    %cst_10 = arith.constant -7.141360e-01 : f32
    %15 = vector.broadcast %cst_10 : f32 to vector<128x128xf32>
    %16 = arith.mulf %15, %6 : vector<128x128xf32>
    %17 = arith.addf %14, %16 : vector<128x128xf32>
    %cst_11 = arith.constant 135.458817 : f32
    %18 = vector.broadcast %cst_11 : f32 to vector<128x128xf32>
    %19 = arith.addf %17, %18 : vector<128x128xf32>
    %cst_12 = arith.constant 1.772000e+00 : f32
    %20 = vector.broadcast %cst_12 : f32 to vector<128x128xf32>
    %21 = arith.mulf %20, %5 : vector<128x128xf32>
    %22 = arith.addf %4, %21 : vector<128x128xf32>
    %cst_13 = arith.constant -2.268160e+02 : f32
    %23 = vector.broadcast %cst_13 : f32 to vector<128x128xf32>
    %24 = arith.addf %22, %23 : vector<128x128xf32>
    %25 = tpu.transpose %11, [1, 0] : vector<128x128xf32> -> vector<128x128xf32>
    %c0_14 = arith.constant 0 : index
    %c0_15 = arith.constant 0 : index
    %c0_16 = arith.constant 0 : index
    %c0_17 = arith.constant 0 : index
    %26 = vector.load %arg4[%c0_14, %c0_15, %c0_16, %c0_17] : memref<1x3x128x128xf32, #tpu.memory_space<vmem>>, vector<1x1x128x128xf32>
    %27 = vector.shape_cast %26 : vector<1x1x128x128xf32> to vector<128x128xf32>
    %28 = vector.shape_cast %25 : vector<128x128xf32> to vector<1x1x128x128xf32>
    tpu.vector_store %arg4[%c0_14, %c0_15, %c0_16, %c0_17], %28 {strides = array<i32>} : memref<1x3x128x128xf32, #tpu.memory_space<vmem>>, vector<1x1x128x128xf32>,
    %29 = tpu.transpose %19, [1, 0] : vector<128x128xf32> -> vector<128x128xf32>
    %c0_18 = arith.constant 0 : index
    %c1_19 = arith.constant 1 : index
    %c0_20 = arith.constant 0 : index
    %c0_21 = arith.constant 0 : index
    %30 = vector.load %arg4[%c0_18, %c1_19, %c0_20, %c0_21] : memref<1x3x128x128xf32, #tpu.memory_space<vmem>>, vector<1x1x128x128xf32>
    %31 = vector.shape_cast %30 : vector<1x1x128x128xf32> to vector<128x128xf32>
    %32 = vector.shape_cast %29 : vector<128x128xf32> to vector<1x1x128x128xf32>
    tpu.vector_store %arg4[%c0_18, %c1_19, %c0_20, %c0_21], %32 {strides = array<i32>} : memref<1x3x128x128xf32, #tpu.memory_space<vmem>>, vector<1x1x128x128xf32>,
    %33 = tpu.transpose %24, [1, 0] : vector<128x128xf32> -> vector<128x128xf32>
    %c0_22 = arith.constant 0 : index
    %c2_23 = arith.constant 2 : index
    %c0_24 = arith.constant 0 : index
    %c0_25 = arith.constant 0 : index
    %34 = vector.load %arg4[%c0_22, %c2_23, %c0_24, %c0_25] : memref<1x3x128x128xf32, #tpu.memory_space<vmem>>, vector<1x1x128x128xf32>
    %35 = vector.shape_cast %34 : vector<1x1x128x128xf32> to vector<128x128xf32>
    %36 = vector.shape_cast %33 : vector<128x128xf32> to vector<1x1x128x128xf32>
    tpu.vector_store %arg4[%c0_22, %c2_23, %c0_24, %c0_25], %36 {strides = array<i32>} : memref<1x3x128x128xf32, #tpu.memory_space<vmem>>, vector<1x1x128x128xf32>,
    return
  }
  func.func @transform_0(%arg0: i32, %arg1: i32, %arg2: i32) -> (i32, i32, i32) {
    %c0_i32 = arith.constant 0 : i32
    return %arg0, %arg1, %arg2 : i32, i32, i32
  }
  func.func @transform_1(%arg0: i32, %arg1: i32, %arg2: i32) -> (i32, i32, i32, i32) {
    %c0_i32 = arith.constant 0 : i32
    %c0_i32_0 = arith.constant 0 : i32
    return %arg0, %c0_i32, %arg1, %arg2 : i32, i32, i32, i32
  }
}

</mosaic_0001>

<bundles_post_ra>
// kernel: ycbcr2rgb_jpeg.1
= control target key start
LH: loop header
LB: loop body
LE: loop exit
PB: predicated region body
PF: predicated region fallthrough
CT: control target
= control target key end

     0   :  { %6 = vsyncpa [#allocation4], 0  ;;  %s1286_s0 = inlined_call_operand.vmem [shape: f32[2,128,384], index: 0, kind: input, shape index: {}]   ;;  %s1287_s1 = inlined_call_operand.hbm [shape: f32[2,3,128,128], index: 1, kind: output, shape index: {}]  }
   0x1   :  { %8 = vsyncpa [#allocation4 + $0x1], 0  ;;  %s1084_s6 = smov 0   ;;  %s1086_s7 = smov 0  }
   0x2   :  { %s1088_s8 = smov 0   ;;  %s1090_s9 = smov 0  }
   0x3   :  { %s1092_s10 = smov 0   ;;  %s1094_s11 = smov 0  }
   0x4 LB: > { %s891_s12 = sadd.s32 4294967295, %s1070_s11   ;;  %s892_s13 = sadd.s32 4294967294, %s1070_s11   ;;  %s1070_s11 = sphi %s1094_s11, %s14_s11   ;;  %s1066_s10 = sphi %s1092_s10, %s1294_s10   ;;  %s1062_s9 = sphi %s1090_s9, %s1293_s9   ;;  %s1058_s8 = sphi %s1088_s8, %s1292_s8   ;;  %s1054_s7 = sphi %s1086_s7, %s1291_s7   ;;  %s1050_s6 = sphi %s1084_s6, %s1290_s6  }
   0x5   : > { %s33_s14 = sadd.s32 1, %s1066_s10  ;;  %s74_s15 = sadd.s32 1, %s1058_s8 }
   0x6   : > { %p35_p0 = scmp.ge.s32.totalorder %s33_s14, 2  ;;  %p84_p1 = scmp.ne.s32.totalorder %s1058_s8, %s1054_s7 }
   0x7   : > { %p85_p2 = scmp.eq.s32.totalorder %s891_s12, 1  ;;  %p90_p3 = scmp.ne.s32.totalorder %s1054_s7, %s1050_s6 }
   0x8   : > { %s1296_s14 = smov (%p35_p0, %s33_s14), 0  ;;  %p91_p5 = scmp.eq.s32.totalorder %s892_s13, 1 }
   0x9   : > { %p1124_p4 = por %p85_p2, %p84_p1  ;;  %s67_s17 = ssub.s32 %s1066_s10, %s1296_s14 }
   0xa   : > { %p895_p6 = scmp.ge.s32.totalorder %s1070_s11, 1  ;;  %p72_p7 = scmp.eq.s32.totalorder %s67_s17, 0 }
   0xb   : > { %p1131_p8 = por %p91_p5, %p90_p3  ;;  %p128_p9 = scmp.lt.s32.totalorder %s1070_s11, 3 }
   0xc   : > { %s1137_s19 = scalar_select %p72_p7, %s1058_s8, %s74_s15  }
   0xd   : > { %p129_p10 = pnand %p895_p6, %p128_p9 }
   0xe   : > { %p159_p11 = scmp.lt.s32.totalorder (!%p129_p10), %s1062_s9, 1  ;;  %s154_s25 = sand.u32 (!%p129_p10), 1, %s1054_s7  }
   0xf   : > { %132 = sbr.rel (%p129_p10) target bundleno = 578 (0x242), region = 24  ;;  %s784_s5 = scalar_lea.sflag (!%p129_p10), [#allocation4], %s154_s25 }
  0x10   : > { %s932_s26 = smul.u32 (!%p129_p10), 384, %s154_s25  ;;  %s1012_s17 = scalar_lea.hbm (!%p129_p10), %s1287_s1, 768 }
  0x11   : > { %s934_s28 = smul.u32 (!%p129_p10), 384, %s1062_s9 }
  0x12   : > { %s1197_s27 = scalar_lea.vmem (!%p129_p10), [#allocation3], %s932_s26 }
  0x13   : > { %s798_s2 = scalar_lea.hbm (!%p129_p10), %s1287_s1, %s934_s28  ;;  %s799_s3 = sshll.u32 (!%p129_p10), %s1197_s27, 4  ;;  %s800_s3 = int_to_ptr.vmem [resolvable:$true] %s799_s3 }
  0x14   : > { %s160_s20 = scalar_select %p159_p11, %s1062_s9, 1 }
  0x15   : > { %s801_s4 = sshll.u32 %s798_s2, 4  ;;  %s802_s4 = int_to_ptr.hbm [resolvable:$true] %s801_s4 }
  0x16   : > { %s933_s21 = smul.u32 384, %s160_s20  ;;  %s1006_s9 = sshra.s32 %s802_s4, 4  ;;  %s1007_s9 = int_to_ptr.hbm [resolvable:$true] %s1006_s9 }
  0x17   : > { %s1008_s12 = scalar_lea.hbm %s1007_s9, 384  ;;  %p1013_p1 = scmp.lt.s32.totalorder %s1007_s9, %s1287_s1 }
  0x18   : > { %s1144_s24 = scalar_lea.vmem %s1286_s0, %s933_s21  ;;  %p1009_p12 = scmp.ne.s32.totalorder %s1007_s9, %s1008_s12 }
  0x19   : > { %v175_v0 = vld [vmem:[%s1144_s24 + $0x8] sm:$0xff]  ;;  %v174_v1 = vld [vmem:[%s1144_s24] sm:$0xff]  ;;  %v177_v3 = vld [vmem:[%s1144_s24 + $0x18] sm:$0xff]  ;;  %p1014_p2 = scmp.lt.s32.totalorder %s1012_s17, %s1008_s12 }
  0x1a   : > { %254 = vxpose.xlu1.b32.start [1/16] %v175_v0, 128  ;;  %222 = vxpose.xlu0.b32.start [1/16] %v174_v1, 128  ;;  %v178_v2 = vld [vmem:[%s1144_s24 + $0x20] sm:$0xff]  ;;  %v181_v4 = vld [vmem:[%s1144_s24 + $0x38] sm:$0xff]  ;;  %v180_v5 = vld [vmem:[%s1144_s24 + $0x30] sm:$0xff]  ;;  %p1010_p13 = pnand %p1009_p12, %p1124_p4 }
  0x1b   : > { %v184_v6 = vld [vmem:[%s1144_s24 + $0x50] sm:$0xff]  ;;  %v183_v7 = vld [vmem:[%s1144_s24 + $0x48] sm:$0xff]  ;;  %v186_v9 = vld [vmem:[%s1144_s24 + $0x60] sm:$0xff]  ;;  %p1015_p3 = por %p1014_p2, %p1013_p1 }
  0x1c   : > { %v187_v8 = vld [vmem:[%s1144_s24 + $0x68] sm:$0xff]  ;;  %v176_v10 = vld [vmem:[%s1144_s24 + $0x10] sm:$0xff]  ;;  %v190_v11 = vld [vmem:[%s1144_s24 + $0x80] sm:$0xff]  ;;  %p1011_p0 = pneg %p1010_p13 }
  0x1d   : > { %286 = vxpose.xlu2.b32.start [1/16] %v176_v10, 128  ;;  %v189_v12 = vld [vmem:[%s1144_s24 + $0x78] sm:$0xff]  ;;  %v179_v13 = vld [vmem:[%s1144_s24 + $0x28] sm:$0xff]  ;;  %v192_v15 = vld [vmem:[%s1144_s24 + $0x90] sm:$0xff] }
  0x1e   : > { %v193_v14 = vld [vmem:[%s1144_s24 + $0x98] sm:$0xff]  ;;  %v182_v16 = vld [vmem:[%s1144_s24 + $0x40] sm:$0xff]  ;;  %v196_v17 = vld [vmem:[%s1144_s24 + $0xb0] sm:$0xff]  ;;  %p1016_p5 = pnand %p1015_p3, %p1011_p0 }
  0x1f   : > { %v195_v18 = vld [vmem:[%s1144_s24 + $0xa8] sm:$0xff]  ;;  %v185_v19 = vld [vmem:[%s1144_s24 + $0x58] sm:$0xff]  ;;  %v198_v21 = vld [vmem:[%s1144_s24 + $0xc0] sm:$0xff] }
  0x20   : > { %v199_v20 = vld [vmem:[%s1144_s24 + $0xc8] sm:$0xff]  ;;  %v188_v22 = vld [vmem:[%s1144_s24 + $0x70] sm:$0xff]  ;;  %v202_v23 = vld [vmem:[%s1144_s24 + $0xe0] sm:$0xff] }
  0x21   : > { %v201_v24 = vld [vmem:[%s1144_s24 + $0xd8] sm:$0xff]  ;;  %v191_v25 = vld [vmem:[%s1144_s24 + $0x88] sm:$0xff]  ;;  %v204_v27 = vld [vmem:[%s1144_s24 + $0xf0] sm:$0xff] }
  0x22   : > { %255 = vxpose.xlu1.b32.cont [2/16] %v178_v2, 128  ;;  %223 = vxpose.xlu0.b32.cont [2/16] %v177_v3, 128  ;;  %v205_v26 = vld [vmem:[%s1144_s24 + $0xf8] sm:$0xff]  ;;  %v194_v28 = vld [vmem:[%s1144_s24 + $0xa0] sm:$0xff]  ;;  %v208_v29 = vld [vmem:[%s1144_s24 + $0x110] sm:$0xff] }
  0x23   : > { %v207_v30 = vld [vmem:[%s1144_s24 + $0x108] sm:$0xff]  ;;  %v197_v31 = vld [vmem:[%s1144_s24 + $0xb8] sm:$0xff]  ;;  %v210_v33 = vld [vmem:[%s1144_s24 + $0x120] sm:$0xff] }
  0x24   : > { %v211_v32 = vld [vmem:[%s1144_s24 + $0x128] sm:$0xff]  ;;  %v200_v34 = vld [vmem:[%s1144_s24 + $0xd0] sm:$0xff]  ;;  %v214_v35 = vld [vmem:[%s1144_s24 + $0x140] sm:$0xff] }
  0x25   : > { %287 = vxpose.xlu2.b32.cont [2/16] %v179_v13, 128  ;;  %v213_v36 = vld [vmem:[%s1144_s24 + $0x138] sm:$0xff]  ;;  %v203_v37 = vld [vmem:[%s1144_s24 + $0xe8] sm:$0xff]  ;;  %v216_v39 = vld [vmem:[%s1144_s24 + $0x150] sm:$0xff] }
  0x26   : > { %v217_v38 = vld [vmem:[%s1144_s24 + $0x158] sm:$0xff]  ;;  %v206_v40 = vld [vmem:[%s1144_s24 + $0x100] sm:$0xff]  ;;  %v220_v41 = vld [vmem:[%s1144_s24 + $0x170] sm:$0xff] }
  0x27   : > { %v219_v42 = vld [vmem:[%s1144_s24 + $0x168] sm:$0xff]  ;;  %v209_v43 = vld [vmem:[%s1144_s24 + $0x118] sm:$0xff]  ;;  %v212_v44 = vld [vmem:[%s1144_s24 + $0x130] sm:$0xff] }
  0x28   : > { %v215_v45 = vld [vmem:[%s1144_s24 + $0x148] sm:$0xff]  ;;  %v218_v46 = vld [vmem:[%s1144_s24 + $0x160] sm:$0xff]  ;;  %v221_v47 = vld [vmem:[%s1144_s24 + $0x178] sm:$0xff] }
  0x2a   : > { %256 = vxpose.xlu1.b32.cont [3/16] %v181_v4, 128  ;;  %224 = vxpose.xlu0.b32.cont [3/16] %v180_v5, 128 }
  0x2d   : > { %288 = vxpose.xlu2.b32.cont [3/16] %v182_v16, 128 }
  0x32   : > { %257 = vxpose.xlu1.b32.cont [4/16] %v184_v6, 128  ;;  %225 = vxpose.xlu0.b32.cont [4/16] %v183_v7, 128 }
  0x35   : > { %289 = vxpose.xlu2.b32.cont [4/16] %v185_v19, 128 }
  0x3a   : > { %258 = vxpose.xlu1.b32.cont [5/16] %v187_v8, 128  ;;  %226 = vxpose.xlu0.b32.cont [5/16] %v186_v9, 128 }
  0x3d   : > { %290 = vxpose.xlu2.b32.cont [5/16] %v188_v22, 128 }
  0x42   : > { %259 = vxpose.xlu1.b32.cont [6/16] %v190_v11, 128  ;;  %227 = vxpose.xlu0.b32.cont [6/16] %v189_v12, 128 }
  0x45   : > { %291 = vxpose.xlu2.b32.cont [6/16] %v191_v25, 128 }
  0x4a   : > { %260 = vxpose.xlu1.b32.cont [7/16] %v193_v14, 128  ;;  %228 = vxpose.xlu0.b32.cont [7/16] %v192_v15, 128 }
  0x4d   : > { %292 = vxpose.xlu2.b32.cont [7/16] %v194_v28, 128 }
  0x52   : > { %261 = vxpose.xlu1.b32.cont [8/16] %v196_v17, 128  ;;  %229 = vxpose.xlu0.b32.cont [8/16] %v195_v18, 128 }
  0x55   : > { %293 = vxpose.xlu2.b32.cont [8/16] %v197_v31, 128 }
  0x5a   : > { %262 = vxpose.xlu1.b32.cont [9/16] %v199_v20, 128  ;;  %230 = vxpose.xlu0.b32.cont [9/16] %v198_v21, 128 }
  0x5d   : > { %294 = vxpose.xlu2.b32.cont [9/16] %v200_v34, 128 }
  0x62   : > { %263 = vxpose.xlu1.b32.cont [10/16] %v202_v23, 128  ;;  %231 = vxpose.xlu0.b32.cont [10/16] %v201_v24, 128 }
  0x65   : > { %295 = vxpose.xlu2.b32.cont [10/16] %v203_v37, 128 }
  0x6a   : > { %264 = vxpose.xlu1.b32.cont [11/16] %v205_v26, 128  ;;  %232 = vxpose.xlu0.b32.cont [11/16] %v204_v27, 128 }
  0x6d   : > { %296 = vxpose.xlu2.b32.cont [11/16] %v206_v40, 128 }
  0x72   : > { %265 = vxpose.xlu1.b32.cont [12/16] %v208_v29, 128  ;;  %233 = vxpose.xlu0.b32.cont [12/16] %v207_v30, 128 }
  0x75   : > { %297 = vxpose.xlu2.b32.cont [12/16] %v209_v43, 128 }
  0x7a   : > { %266 = vxpose.xlu1.b32.cont [13/16] %v211_v32, 128  ;;  %234 = vxpose.xlu0.b32.cont [13/16] %v210_v33, 128 }
  0x7d   : > { %298 = vxpose.xlu2.b32.cont [13/16] %v212_v44, 128 }
  0x82   : > { %267 = vxpose.xlu1.b32.cont [14/16] %v214_v35, 128  ;;  %235 = vxpose.xlu0.b32.cont [14/16] %v213_v36, 128 }
  0x85   : > { %299 = vxpose.xlu2.b32.cont [14/16] %v215_v45, 128 }
  0x8a   : > { %268 = vxpose.xlu1.b32.cont [15/16] %v217_v38, 128  ;;  %236 = vxpose.xlu0.b32.cont [15/16] %v216_v39, 128 }
  0x8d   : > { %300 = vxpose.xlu2.b32.cont [15/16] %v218_v46, 128 }
  0x92   : > { %269 = vxpose.xlu1.b32.end [16/16] %v220_v41, 128  ;;  %237 = vxpose.xlu0.b32.end [16/16] %v219_v42, 128 }
  0x95   : > { %301 = vxpose.xlu2.b32.end [16/16] %v221_v47, 128 }
  0xb6   : > { %v302_v62 = vpop.trf.xlu2 }
  0xb7   : > { %350 = vst [vmem:[#allocation2 + $0x100] sm:$0xff] %v302_v62 }
  0xbe   : > { %v270_v48 = vpop.trf.xlu1  ;;  %v238_v49 = vpop.trf.xlu0 }
  0xbf   : > { %334 = vst [vmem:[#allocation2 + $0x80] sm:$0xff] %v270_v48  ;;  %v303_v9 = vpop.trf.xlu2 }
  0xc0   : > { %318 = vst [vmem:[#allocation2] sm:$0xff] %v238_v49 }
  0xc1   : > { %351 = vst [vmem:[#allocation2 + $0x108] sm:$0xff] %v303_v9 }
  0xc6   : > { %v271_v50 = vpop.trf.xlu1  ;;  %v239_v51 = vpop.trf.xlu0 }
  0xc7   : > { %335 = vst [vmem:[#allocation2 + $0x88] sm:$0xff] %v271_v50  ;;  %v304_v12 = vpop.trf.xlu2 }
  0xc8   : > { %319 = vst [vmem:[#allocation2 + $0x8] sm:$0xff] %v239_v51 }
  0xc9   : > { %352 = vst [vmem:[#allocation2 + $0x110] sm:$0xff] %v304_v12 }
  0xce   : > { %v272_v52 = vpop.trf.xlu1  ;;  %v240_v53 = vpop.trf.xlu0 }
  0xcf   : > { %336 = vst [vmem:[#allocation2 + $0x90] sm:$0xff] %v272_v52  ;;  %v305_v21 = vpop.trf.xlu2 }
  0xd0   : > { %320 = vst [vmem:[#allocation2 + $0x10] sm:$0xff] %v240_v53 }
  0xd1   : > { %353 = vst [vmem:[#allocation2 + $0x118] sm:$0xff] %v305_v21 }
  0xd6   : > { %v273_v54 = vpop.trf.xlu1  ;;  %v241_v55 = vpop.trf.xlu0 }
  0xd7   : > { %337 = vst [vmem:[#allocation2 + $0x98] sm:$0xff] %v273_v54  ;;  %v398_v56 = vld [vmem:[#allocation2 + $0x1] ss:$3 sm:$0xff]  ;;  %v430_v58 = vld [vmem:[#allocation2 + $0x2] ss:$3 sm:$0xff]  ;;  %v306_v32 = vpop.trf.xlu2 }
  0xd8   : > { %321 = vst [vmem:[#allocation2 + $0x18] sm:$0xff] %v241_v55  ;;  %v589_v57 = vmul.f32 1.772, %v398_v56  ;;  %v366_v59 = vld [vmem:[#allocation2] ss:$3 sm:$0xff] }
  0xd9   : > { %v461_v60 = vmul.f32 1.402, %v430_v58  ;;  %v509_v61 = vmul.f32 -0.344136, %v398_v56  ;;  %v541_v2 = vmul.f32 -0.714136, %v430_v58 }
  0xda   : > { %v605_v63 = vadd.f32 %v589_v57, %v366_v59  ;;  %354 = vst [vmem:[#allocation2 + $0x120] sm:$0xff] %v306_v32 }
  0xdb   : > { %v477_v0 = vadd.f32 %v461_v60, %v366_v59  ;;  %v525_v1 = vadd.f32 %v509_v61, %v366_v59 }
  0xdc   : > { %v621_v3 = vadd.f32 -226.816, %v605_v63 }
  0xdd   : > { %v493_v4 = vadd.f32 -179.456, %v477_v0  ;;  %v557_v5 = vadd.f32 %v541_v2, %v525_v1 }
  0xde   : > { %734 = vxpose.xlu2.b32.start [1/16] %v621_v3, 128  ;;  %v274_v6 = vpop.trf.xlu1  ;;  %v242_v7 = vpop.trf.xlu0 }
  0xdf   : > { %637 = vxpose.xlu0.b32.start [1/16] %v493_v4, 128  ;;  %338 = vst [vmem:[#allocation2 + $0xa0] sm:$0xff] %v274_v6  ;;  %v573_v8 = vadd.f32 135.45882, %v557_v5  ;;  %v307_v35 = vpop.trf.xlu2 }
  0xe0   : > { %322 = vst [vmem:[#allocation2 + $0x20] sm:$0xff] %v242_v7 }
  0xe1   : > { %685 = vxpose.xlu1.b32.start [1/16] %v573_v8, 128  ;;  %355 = vst [vmem:[#allocation2 + $0x128] sm:$0xff] %v307_v35 }
  0xe6   : > { %v275_v10 = vpop.trf.xlu1  ;;  %v243_v11 = vpop.trf.xlu0 }
  0xe7   : > { %339 = vst [vmem:[#allocation2 + $0xa8] sm:$0xff] %v275_v10  ;;  %v308_v44 = vpop.trf.xlu2 }
  0xe8   : > { %323 = vst [vmem:[#allocation2 + $0x28] sm:$0xff] %v243_v11 }
  0xe9   : > { %356 = vst [vmem:[#allocation2 + $0x130] sm:$0xff] %v308_v44 }
  0xee   : > { %v276_v13 = vpop.trf.xlu1  ;;  %v244_v14 = vpop.trf.xlu0 }
  0xef   : > { %340 = vst [vmem:[#allocation2 + $0xb0] sm:$0xff] %v276_v13  ;;  %v400_v15 = vld [vmem:[#allocation2 + $0x19] ss:$3 sm:$0xff]  ;;  %v432_v17 = vld [vmem:[#allocation2 + $0x1a] ss:$3 sm:$0xff]  ;;  %v309_v55 = vpop.trf.xlu2 }
  0xf0   : > { %324 = vst [vmem:[#allocation2 + $0x30] sm:$0xff] %v244_v14  ;;  %v590_v16 = vmul.f32 1.772, %v400_v15  ;;  %v368_v18 = vld [vmem:[#allocation2 + $0x18] ss:$3 sm:$0xff] }
  0xf1   : > { %v462_v19 = vmul.f32 1.402, %v432_v17  ;;  %v510_v20 = vmul.f32 -0.344136, %v400_v15  ;;  %v542_v25 = vmul.f32 -0.714136, %v432_v17 }
  0xf2   : > { %v606_v22 = vadd.f32 %v590_v16, %v368_v18  ;;  %357 = vst [vmem:[#allocation2 + $0x138] sm:$0xff] %v309_v55 }
  0xf3   : > { %v478_v23 = vadd.f32 %v462_v19, %v368_v18  ;;  %v526_v24 = vadd.f32 %v510_v20, %v368_v18 }
  0xf4   : > { %v622_v26 = vadd.f32 -226.816, %v606_v22 }
  0xf5   : > { %v494_v27 = vadd.f32 -179.456, %v478_v23  ;;  %v558_v28 = vadd.f32 %v542_v25, %v526_v24 }
  0xf6   : > { %735 = vxpose.xlu2.b32.cont [2/16] %v622_v26, 128  ;;  %v277_v29 = vpop.trf.xlu1  ;;  %v245_v30 = vpop.trf.xlu0 }
  0xf7   : > { %638 = vxpose.xlu0.b32.cont [2/16] %v494_v27, 128  ;;  %341 = vst [vmem:[#allocation2 + $0xb8] sm:$0xff] %v277_v29  ;;  %v574_v31 = vadd.f32 135.45882, %v558_v28  ;;  %v310_v58 = vpop.trf.xlu2 }
  0xf8   : > { %325 = vst [vmem:[#allocation2 + $0x38] sm:$0xff] %v245_v30 }
  0xf9   : > { %686 = vxpose.xlu1.b32.cont [2/16] %v574_v31, 128  ;;  %358 = vst [vmem:[#allocation2 + $0x140] sm:$0xff] %v310_v58 }
  0xfe   : > { %v278_v33 = vpop.trf.xlu1  ;;  %v246_v34 = vpop.trf.xlu0 }
  0xff   : > { %342 = vst [vmem:[#allocation2 + $0xc0] sm:$0xff] %v278_v33  ;;  %v311_v3 = vpop.trf.xlu2 }
 0x100   : > { %326 = vst [vmem:[#allocation2 + $0x40] sm:$0xff] %v246_v34 }
 0x101   : > { %359 = vst [vmem:[#allocation2 + $0x148] sm:$0xff] %v311_v3 }
 0x106   : > { %v279_v36 = vpop.trf.xlu1  ;;  %v247_v37 = vpop.trf.xlu0 }
 0x107   : > { %343 = vst [vmem:[#allocation2 + $0xc8] sm:$0xff] %v279_v36  ;;  %v402_v38 = vld [vmem:[#allocation2 + $0x31] ss:$3 sm:$0xff]  ;;  %v434_v40 = vld [vmem:[#allocation2 + $0x32] ss:$3 sm:$0xff]  ;;  %v312_v14 = vpop.trf.xlu2 }
 0x108   : > { %327 = vst [vmem:[#allocation2 + $0x48] sm:$0xff] %v247_v37  ;;  %v591_v39 = vmul.f32 1.772, %v402_v38  ;;  %v370_v41 = vld [vmem:[#allocation2 + $0x30] ss:$3 sm:$0xff] }
 0x109   : > { %v463_v42 = vmul.f32 1.402, %v434_v40  ;;  %v511_v43 = vmul.f32 -0.344136, %v402_v38  ;;  %v543_v48 = vmul.f32 -0.714136, %v434_v40 }
 0x10a   : > { %v607_v45 = vadd.f32 %v591_v39, %v370_v41  ;;  %360 = vst [vmem:[#allocation2 + $0x150] sm:$0xff] %v312_v14  ;;  %v410_v36 = vld [vmem:[#allocation2 + $0x91] ss:$3 sm:$0xff] }
 0x10b   : > { %v479_v46 = vadd.f32 %v463_v42, %v370_v41  ;;  %v527_v47 = vadd.f32 %v511_v43, %v370_v41 }
 0x10c   : > { %v623_v49 = vadd.f32 -226.816, %v607_v45 }
 0x10d   : > { %v495_v50 = vadd.f32 -179.456, %v479_v46  ;;  %v559_v51 = vadd.f32 %v543_v48, %v527_v47  ;;  %v442_v46 = vld [vmem:[#allocation2 + $0x92] ss:$3 sm:$0xff]  ;;  %v515_v48 = vmul.f32 -0.344136, %v410_v36 }
 0x10e   : > { %736 = vxpose.xlu2.b32.cont [3/16] %v623_v49, 128  ;;  %v280_v52 = vpop.trf.xlu1  ;;  %v248_v53 = vpop.trf.xlu0 }
 0x10f   : > { %639 = vxpose.xlu0.b32.cont [3/16] %v495_v50, 128  ;;  %344 = vst [vmem:[#allocation2 + $0xd0] sm:$0xff] %v280_v52  ;;  %v575_v54 = vadd.f32 135.45882, %v559_v51  ;;  %v313_v17 = vpop.trf.xlu2  ;;  %v378_v51 = vld [vmem:[#allocation2 + $0x90] ss:$3 sm:$0xff] }
 0x110   : > { %328 = vst [vmem:[#allocation2 + $0x50] sm:$0xff] %v248_v53  ;;  %v595_v52 = vmul.f32 1.772, %v410_v36 }
 0x111   : > { %687 = vxpose.xlu1.b32.cont [3/16] %v575_v54, 128  ;;  %361 = vst [vmem:[#allocation2 + $0x158] sm:$0xff] %v313_v17  ;;  %v467_v54 = vmul.f32 1.402, %v442_v46 }
 0x112   : > { %v611_v58 = vadd.f32 %v595_v52, %v378_v51  ;;  %v420_v52 = vld [vmem:[#allocation2 + $0x109] ss:$3 sm:$0xff] }
 0x116   : > { %v281_v56 = vpop.trf.xlu1  ;;  %v249_v57 = vpop.trf.xlu0  ;;  %v382_v17 = vld [vmem:[#allocation2 + $0xc0] ss:$3 sm:$0xff] }
 0x117   : > { %345 = vst [vmem:[#allocation2 + $0xd8] sm:$0xff] %v281_v56  ;;  %v314_v26 = vpop.trf.xlu2  ;;  %v531_v56 = vadd.f32 %v515_v48, %v378_v51 }
 0x118   : > { %329 = vst [vmem:[#allocation2 + $0x58] sm:$0xff] %v249_v57  ;;  %v547_v57 = vmul.f32 -0.714136, %v442_v46 }
 0x119   : > { %362 = vst [vmem:[#allocation2 + $0x160] sm:$0xff] %v314_v26 }
 0x11e   : > { %v282_v59 = vpop.trf.xlu1  ;;  %v250_v60 = vpop.trf.xlu0 }
 0x11f   : > { %346 = vst [vmem:[#allocation2 + $0xe0] sm:$0xff] %v282_v59  ;;  %v404_v61 = vld [vmem:[#allocation2 + $0x49] ss:$3 sm:$0xff]  ;;  %v436_v63 = vld [vmem:[#allocation2 + $0x4a] ss:$3 sm:$0xff]  ;;  %v315_v42 = vpop.trf.xlu2 }
 0x120   : > { %330 = vst [vmem:[#allocation2 + $0x60] sm:$0xff] %v250_v60  ;;  %v592_v62 = vmul.f32 1.772, %v404_v61  ;;  %v372_v0 = vld [vmem:[#allocation2 + $0x48] ss:$3 sm:$0xff]  ;;  %v483_v60 = vadd.f32 %v467_v54, %v378_v51 }
 0x121   : > { %v464_v1 = vmul.f32 1.402, %v436_v63  ;;  %v512_v2 = vmul.f32 -0.344136, %v404_v61  ;;  %v544_v7 = vmul.f32 -0.714136, %v436_v63  ;;  %v563_v63 = vadd.f32 %v547_v57, %v531_v56 }
 0x122   : > { %v608_v4 = vadd.f32 %v592_v62, %v372_v0  ;;  %363 = vst [vmem:[#allocation2 + $0x168] sm:$0xff] %v315_v42  ;;  %v412_v59 = vld [vmem:[#allocation2 + $0xa9] ss:$3 sm:$0xff]  ;;  %v444_v62 = vld [vmem:[#allocation2 + $0xaa] ss:$3 sm:$0xff] }
 0x123   : > { %v480_v5 = vadd.f32 %v464_v1, %v372_v0  ;;  %v528_v6 = vadd.f32 %v512_v2, %v372_v0  ;;  %v516_v0 = vmul.f32 -0.344136, %v412_v59  ;;  %v627_v1 = vadd.f32 -226.816, %v611_v58  ;;  %v380_v2 = vld [vmem:[#allocation2 + $0xa8] ss:$3 sm:$0xff] }
 0x124   : > { %v624_v8 = vadd.f32 -226.816, %v608_v4  ;;  %v596_v3 = vmul.f32 1.772, %v412_v59  ;;  %v499_v4 = vadd.f32 -179.456, %v483_v60 }
 0x125   : > { %v496_v9 = vadd.f32 -179.456, %v480_v5  ;;  %v560_v10 = vadd.f32 %v544_v7, %v528_v6  ;;  %v468_v5 = vmul.f32 1.402, %v444_v62  ;;  %v579_v6 = vadd.f32 135.45882, %v563_v63 }
 0x126   : > { %737 = vxpose.xlu2.b32.cont [4/16] %v624_v8, 128  ;;  %v283_v11 = vpop.trf.xlu1  ;;  %v251_v12 = vpop.trf.xlu0  ;;  %v532_v7 = vadd.f32 %v516_v0, %v380_v2  ;;  %v548_v8 = vmul.f32 -0.714136, %v444_v62  ;;  %v520_v57 = vmul.f32 -0.344136, %v420_v52  ;;  %v388_v59 = vld [vmem:[#allocation2 + $0x108] ss:$3 sm:$0xff] }
 0x127   : > { %640 = vxpose.xlu0.b32.cont [4/16] %v496_v9, 128  ;;  %347 = vst [vmem:[#allocation2 + $0xe8] sm:$0xff] %v283_v11  ;;  %v576_v13 = vadd.f32 135.45882, %v560_v10  ;;  %v316_v61 = vpop.trf.xlu2  ;;  %v612_v9 = vadd.f32 %v596_v3, %v380_v2  ;;  %v414_v10 = vld [vmem:[#allocation2 + $0xc1] ss:$3 sm:$0xff]  ;;  %v484_v11 = vadd.f32 %v468_v5, %v380_v2 }
 0x128   : > { %331 = vst [vmem:[#allocation2 + $0x68] sm:$0xff] %v251_v12  ;;  %v564_v14 = vadd.f32 %v548_v8, %v532_v7  ;;  %v600_v60 = vmul.f32 1.772, %v420_v52  ;;  %v536_v0 = vadd.f32 %v520_v57, %v388_v59  ;;  %v422_v3 = vld [vmem:[#allocation2 + $0x121] ss:$3 sm:$0xff] }
 0x129   : > { %688 = vxpose.xlu1.b32.cont [4/16] %v576_v13, 128  ;;  %364 = vst [vmem:[#allocation2 + $0x170] sm:$0xff] %v316_v61  ;;  %v446_v13 = vld [vmem:[#allocation2 + $0xc2] ss:$3 sm:$0xff]  ;;  %v521_v7 = vmul.f32 -0.344136, %v422_v3 }
 0x12a   : > { %v616_v2 = vadd.f32 %v600_v60, %v388_v59  ;;  %v454_v5 = vld [vmem:[#allocation2 + $0x122] ss:$3 sm:$0xff] }
 0x12c   : > { %v632_v8 = vadd.f32 -226.816, %v616_v2 }
 0x12e   : > { %v284_v15 = vpop.trf.xlu1  ;;  %v252_v16 = vpop.trf.xlu0 }
 0x12f   : > { %348 = vst [vmem:[#allocation2 + $0xf0] sm:$0xff] %v284_v15  ;;  %v317_v12 = vpop.trf.xlu2  ;;  %v517_v15 = vmul.f32 -0.344136, %v414_v10 }
 0x130   : > { %332 = vst [vmem:[#allocation2 + $0x70] sm:$0xff] %v252_v16  ;;  %v628_v16 = vadd.f32 -226.816, %v612_v9  ;;  %v390_v9 = vld [vmem:[#allocation2 + $0x120] ss:$3 sm:$0xff] }
 0x131   : > { %365 = vst [vmem:[#allocation2 + $0x178] sm:$0xff] %v317_v12  ;;  %v473_v12 = vmul.f32 1.402, %v454_v5 }
 0x136   : > { %v285_v18 = vpop.trf.xlu1  ;;  %v253_v19 = vpop.trf.xlu0 }
 0x137   : > { %349 = vst [vmem:[#allocation2 + $0xf8] sm:$0xff] %v285_v18  ;;  %v406_v20 = vld [vmem:[#allocation2 + $0x61] ss:$3 sm:$0xff]  ;;  %v438_v22 = vld [vmem:[#allocation2 + $0x62] ss:$3 sm:$0xff] }
 0x138   : > { %333 = vst [vmem:[#allocation2 + $0x78] sm:$0xff] %v253_v19  ;;  %v593_v21 = vmul.f32 1.772, %v406_v20  ;;  %v374_v23 = vld [vmem:[#allocation2 + $0x60] ss:$3 sm:$0xff] }
 0x139   : > { %v465_v24 = vmul.f32 1.402, %v438_v22  ;;  %v513_v25 = vmul.f32 -0.344136, %v406_v20  ;;  %v545_v30 = vmul.f32 -0.714136, %v438_v22  ;;  %v533_v22 = vadd.f32 %v517_v15, %v382_v17 }
 0x13a   : > { %v609_v27 = vadd.f32 %v593_v21, %v374_v23  ;;  %v597_v18 = vmul.f32 1.772, %v414_v10  ;;  %v500_v19 = vadd.f32 -179.456, %v484_v11  ;;  %v469_v20 = vmul.f32 1.402, %v446_v13 }
 0x13b   : > { %v481_v28 = vadd.f32 %v465_v24, %v374_v23  ;;  %v529_v29 = vadd.f32 %v513_v25, %v374_v23  ;;  %v580_v21 = vadd.f32 135.45882, %v564_v14  ;;  %v549_v23 = vmul.f32 -0.714136, %v446_v13  ;;  %v416_v25 = vld [vmem:[#allocation2 + $0xd9] ss:$3 sm:$0xff] }
 0x13c   : > { %v625_v31 = vadd.f32 -226.816, %v609_v27  ;;  %v613_v24 = vadd.f32 %v597_v18, %v382_v17  ;;  %v485_v26 = vadd.f32 %v469_v20, %v382_v17  ;;  %v448_v27 = vld [vmem:[#allocation2 + $0xda] ss:$3 sm:$0xff]  ;;  %v601_v10 = vmul.f32 1.772, %v422_v3 }
 0x13d   : > { %v497_v32 = vadd.f32 -179.456, %v481_v28  ;;  %v561_v33 = vadd.f32 %v545_v30, %v529_v29  ;;  %v565_v28 = vadd.f32 %v549_v23, %v533_v22  ;;  %v518_v29 = vmul.f32 -0.344136, %v416_v25  ;;  %v424_v17 = vld [vmem:[#allocation2 + $0x139] ss:$3 sm:$0xff] }
 0x13e   : > { %738 = vxpose.xlu2.b32.cont [5/16] %v625_v31, 128  ;;  %v629_v30 = vadd.f32 -226.816, %v613_v24  ;;  %v384_v31 = vld [vmem:[#allocation2 + $0xd8] ss:$3 sm:$0xff]  ;;  %v386_v48 = vld [vmem:[#allocation2 + $0xf0] ss:$3 sm:$0xff]  ;;  %v537_v14 = vadd.f32 %v521_v7, %v390_v9  ;;  %v489_v18 = vadd.f32 %v473_v12, %v390_v9 }
 0x13f   : > { %641 = vxpose.xlu0.b32.cont [5/16] %v497_v32, 128  ;;  %v577_v34 = vadd.f32 135.45882, %v561_v33  ;;  %v408_v35 = vld [vmem:[#allocation2 + $0x79] ss:$3 sm:$0xff]  ;;  %v440_v38 = vld [vmem:[#allocation2 + $0x7a] ss:$3 sm:$0xff]  ;;  %v534_v36 = vadd.f32 %v518_v29, %v384_v31 }
 0x140   : > { %v594_v37 = vmul.f32 1.772, %v408_v35  ;;  %v514_v39 = vmul.f32 -0.344136, %v408_v35  ;;  %v376_v40 = vld [vmem:[#allocation2 + $0x78] ss:$3 sm:$0xff] }
 0x141   : > { %689 = vxpose.xlu1.b32.cont [5/16] %v577_v34, 128  ;;  %v466_v41 = vmul.f32 1.402, %v440_v38  ;;  %v546_v45 = vmul.f32 -0.714136, %v440_v38  ;;  %v598_v32 = vmul.f32 1.772, %v416_v25 }
 0x142   : > { %v610_v43 = vadd.f32 %v594_v37, %v376_v40  ;;  %v530_v44 = vadd.f32 %v514_v39, %v376_v40  ;;  %v501_v33 = vadd.f32 -179.456, %v485_v26  ;;  %v470_v34 = vmul.f32 1.402, %v448_v27  ;;  %v418_v39 = vld [vmem:[#allocation2 + $0xf1] ss:$3 sm:$0xff] }
 0x143   : > { %v482_v47 = vadd.f32 %v466_v41, %v376_v40  ;;  %v581_v35 = vadd.f32 135.45882, %v565_v28  ;;  %v550_v37 = vmul.f32 -0.714136, %v448_v27  ;;  %v614_v38 = vadd.f32 %v598_v32, %v384_v31  ;;  %v450_v41 = vld [vmem:[#allocation2 + $0xf2] ss:$3 sm:$0xff] }
 0x144   : > { %v626_v49 = vadd.f32 -226.816, %v610_v43  ;;  %v562_v50 = vadd.f32 %v546_v45, %v530_v44  ;;  %v486_v40 = vadd.f32 %v470_v34, %v384_v31  ;;  %v519_v43 = vmul.f32 -0.344136, %v418_v39  ;;  %v392_v23 = vld [vmem:[#allocation2 + $0x138] ss:$3 sm:$0xff] }
 0x145   : > { %v498_v53 = vadd.f32 -179.456, %v482_v47  ;;  %v566_v42 = vadd.f32 %v550_v37, %v534_v36  ;;  %v630_v44 = vadd.f32 -226.816, %v614_v38  ;;  %v599_v45 = vmul.f32 1.772, %v418_v39 }
 0x146   : > { %739 = vxpose.xlu2.b32.cont [6/16] %v626_v49, 128  ;;  %v578_v55 = vadd.f32 135.45882, %v562_v50  ;;  %v502_v46 = vadd.f32 -179.456, %v486_v40  ;;  %v471_v47 = vmul.f32 1.402, %v450_v41  ;;  %v535_v50 = vadd.f32 %v519_v43, %v386_v48 }
 0x147   : > { %642 = vxpose.xlu0.b32.cont [6/16] %v498_v53, 128  ;;  %v582_v49 = vadd.f32 135.45882, %v566_v42  ;;  %v615_v51 = vadd.f32 %v599_v45, %v386_v48  ;;  %v551_v54 = vmul.f32 -0.714136, %v450_v41  ;;  %v553_v15 = vmul.f32 -0.714136, %v454_v5 }
 0x148   : > { %v487_v53 = vadd.f32 %v471_v47, %v386_v48  ;;  %v602_v24 = vmul.f32 1.772, %v424_v17  ;;  %v505_v25 = vadd.f32 -179.456, %v489_v18  ;;  %v426_v31 = vld [vmem:[#allocation2 + $0x151] ss:$3 sm:$0xff] }
 0x149   : > { %690 = vxpose.xlu1.b32.cont [6/16] %v578_v55, 128  ;;  %v452_v55 = vld [vmem:[#allocation2 + $0x10a] ss:$3 sm:$0xff]  ;;  %v567_v56 = vadd.f32 %v551_v54, %v535_v50  ;;  %v631_v58 = vadd.f32 -226.816, %v615_v51  ;;  %v569_v20 = vadd.f32 %v553_v15, %v537_v14  ;;  %v603_v38 = vmul.f32 1.772, %v426_v31 }
 0x14a   : > { %v503_v61 = vadd.f32 -179.456, %v487_v53  ;;  %v472_v62 = vmul.f32 1.402, %v452_v55  ;;  %v394_v37 = vld [vmem:[#allocation2 + $0x150] ss:$3 sm:$0xff] }
 0x14b   : > { %v583_v63 = vadd.f32 135.45882, %v567_v56  ;;  %v585_v27 = vadd.f32 135.45882, %v569_v20  ;;  %v428_v45 = vld [vmem:[#allocation2 + $0x169] ss:$3 sm:$0xff] }
 0x14c   : > { %v460_v47 = vld [vmem:[#allocation2 + $0x16a] ss:$3 sm:$0xff]  ;;  %v396_v51 = vld [vmem:[#allocation2 + $0x168] ss:$3 sm:$0xff]  ;;  %v604_v52 = vmul.f32 1.772, %v428_v45 }
 0x14d   : > { %v476_v54 = vmul.f32 1.402, %v460_v47  ;;  %v556_v57 = vmul.f32 -0.714136, %v460_v47 }
 0x14e   : > { %740 = vxpose.xlu2.b32.cont [7/16] %v627_v1, 128  ;;  %v552_v1 = vmul.f32 -0.714136, %v452_v55 }
 0x14f   : > { %643 = vxpose.xlu0.b32.cont [7/16] %v499_v4, 128  ;;  %v488_v4 = vadd.f32 %v472_v62, %v388_v59  ;;  %v492_v59 = vadd.f32 %v476_v54, %v396_v51 }
 0x151   : > { %691 = vxpose.xlu1.b32.cont [7/16] %v579_v6, 128  ;;  %v568_v6 = vadd.f32 %v552_v1, %v536_v0  ;;  %v504_v11 = vadd.f32 -179.456, %v488_v4  ;;  %v508_v62 = vadd.f32 -179.456, %v492_v59 }
 0x153   : > { %v584_v13 = vadd.f32 135.45882, %v568_v6 }
 0x156   : > { %741 = vxpose.xlu2.b32.cont [8/16] %v628_v16, 128  ;;  %v617_v16 = vadd.f32 %v601_v10, %v390_v9 }
 0x157   : > { %644 = vxpose.xlu0.b32.cont [8/16] %v500_v19, 128  ;;  %v456_v19 = vld [vmem:[#allocation2 + $0x13a] ss:$3 sm:$0xff] }
 0x158   : > { %v633_v22 = vadd.f32 -226.816, %v617_v16  ;;  %v474_v26 = vmul.f32 1.402, %v456_v19  ;;  %v554_v29 = vmul.f32 -0.714136, %v456_v19 }
 0x159   : > { %692 = vxpose.xlu1.b32.cont [8/16] %v580_v21, 128  ;;  %v522_v21 = vmul.f32 -0.344136, %v424_v17 }
 0x15a   : > { %v490_v32 = vadd.f32 %v474_v26, %v392_v23 }
 0x15b   : > { %v538_v28 = vadd.f32 %v522_v21, %v392_v23 }
 0x15c   : > { %v506_v39 = vadd.f32 -179.456, %v490_v32 }
 0x15d   : > { %v570_v34 = vadd.f32 %v554_v29, %v538_v28 }
 0x15e   : > { %742 = vxpose.xlu2.b32.cont [9/16] %v629_v30, 128  ;;  %v618_v30 = vadd.f32 %v602_v24, %v392_v23 }
 0x15f   : > { %645 = vxpose.xlu0.b32.cont [9/16] %v501_v33, 128  ;;  %v458_v33 = vld [vmem:[#allocation2 + $0x152] ss:$3 sm:$0xff]  ;;  %v586_v41 = vadd.f32 135.45882, %v570_v34 }
 0x160   : > { %v634_v36 = vadd.f32 -226.816, %v618_v30  ;;  %v475_v40 = vmul.f32 1.402, %v458_v33  ;;  %v555_v43 = vmul.f32 -0.714136, %v458_v33 }
 0x161   : > { %693 = vxpose.xlu1.b32.cont [9/16] %v581_v35, 128  ;;  %v523_v35 = vmul.f32 -0.344136, %v426_v31 }
 0x163   : > { %v539_v42 = vadd.f32 %v523_v35, %v394_v37 }
 0x165   : > { %v571_v48 = vadd.f32 %v555_v43, %v539_v42 }
 0x166   : > { %743 = vxpose.xlu2.b32.cont [10/16] %v630_v44, 128  ;;  %v619_v44 = vadd.f32 %v603_v38, %v394_v37 }
 0x167   : > { %646 = vxpose.xlu0.b32.cont [10/16] %v502_v46, 128  ;;  %v491_v46 = vadd.f32 %v475_v40, %v394_v37  ;;  %v587_v55 = vadd.f32 135.45882, %v571_v48 }
 0x168   : > { %v635_v50 = vadd.f32 -226.816, %v619_v44 }
 0x169   : > { %694 = vxpose.xlu1.b32.cont [10/16] %v582_v49, 128  ;;  %v524_v49 = vmul.f32 -0.344136, %v428_v45  ;;  %v507_v53 = vadd.f32 -179.456, %v491_v46 }
 0x16b   : > { %v540_v56 = vadd.f32 %v524_v49, %v396_v51 }
 0x16d   : > { %v572_v60 = vadd.f32 %v556_v57, %v540_v56 }
 0x16e   : > { %744 = vxpose.xlu2.b32.cont [11/16] %v631_v58, 128  ;;  %v620_v58 = vadd.f32 %v604_v52, %v396_v51 }
 0x16f   : > { %647 = vxpose.xlu0.b32.cont [11/16] %v503_v61, 128 }
 0x170   : > { %v636_v61 = vadd.f32 -226.816, %v620_v58 }
 0x171   : > { %695 = vxpose.xlu1.b32.cont [11/16] %v583_v63, 128  ;;  %v588_v63 = vadd.f32 135.45882, %v572_v60 }
 0x176   : > { %745 = vxpose.xlu2.b32.cont [12/16] %v632_v8, 128 }
 0x177   : > { %648 = vxpose.xlu0.b32.cont [12/16] %v504_v11, 128 }
 0x179   : > { %696 = vxpose.xlu1.b32.cont [12/16] %v584_v13, 128 }
 0x17e   : > { %746 = vxpose.xlu2.b32.cont [13/16] %v633_v22, 128 }
 0x17f   : > { %649 = vxpose.xlu0.b32.cont [13/16] %v505_v25, 128 }
 0x181   : > { %697 = vxpose.xlu1.b32.cont [13/16] %v585_v27, 128 }
 0x186   : > { %747 = vxpose.xlu2.b32.cont [14/16] %v634_v36, 128 }
 0x187   : > { %650 = vxpose.xlu0.b32.cont [14/16] %v506_v39, 128 }
 0x189   : > { %698 = vxpose.xlu1.b32.cont [14/16] %v586_v41, 128 }
 0x18e   : > { %748 = vxpose.xlu2.b32.cont [15/16] %v635_v50, 128 }
 0x18f   : > { %651 = vxpose.xlu0.b32.cont [15/16] %v507_v53, 128 }
 0x191   : > { %699 = vxpose.xlu1.b32.cont [15/16] %v587_v55, 128 }
 0x196   : > { %749 = vxpose.xlu2.b32.end [16/16] %v636_v61, 128 }
 0x197   : > { %652 = vxpose.xlu0.b32.end [16/16] %v508_v62, 128 }
 0x199   : > { %700 = vxpose.xlu1.b32.end [16/16] %v588_v63, 128 }
 0x1b7   : > { %v750_v0 = vpop.trf.xlu2 }
 0x1b8   : > { %913 = vst [vmem:[%s1197_s27 + $0x100] sm:$0xff] %v750_v0 }
 0x1bf   : > { %v751_v1 = vpop.trf.xlu2 }
 0x1c0   : > { %914 = vst [vmem:[%s1197_s27 + $0x108] sm:$0xff] %v751_v1 }
 0x1c3   : > { %v653_v2 = vpop.trf.xlu0 }
 0x1c4   : > { %669 = vst [vmem:[%s1197_s27] sm:$0xff] %v653_v2 }
 0x1c5   : > { %v701_v3 = vpop.trf.xlu1 }
 0x1c6   : > { %897 = vst [vmem:[%s1197_s27 + $0x80] sm:$0xff] %v701_v3 }
 0x1c7   : > { %v752_v4 = vpop.trf.xlu2 }
 0x1c8   : > { %915 = vst [vmem:[%s1197_s27 + $0x110] sm:$0xff] %v752_v4 }
 0x1cb   : > { %v654_v5 = vpop.trf.xlu0 }
 0x1cc   : > { %670 = vst [vmem:[%s1197_s27 + $0x8] sm:$0xff] %v654_v5 }
 0x1cd   : > { %v702_v6 = vpop.trf.xlu1 }
 0x1ce   : > { %898 = vst [vmem:[%s1197_s27 + $0x88] sm:$0xff] %v702_v6 }
 0x1cf   : > { %v753_v7 = vpop.trf.xlu2 }
 0x1d0   : > { %916 = vst [vmem:[%s1197_s27 + $0x118] sm:$0xff] %v753_v7 }
 0x1d3   : > { %v655_v8 = vpop.trf.xlu0 }
 0x1d4   : > { %671 = vst [vmem:[%s1197_s27 + $0x10] sm:$0xff] %v655_v8 }
 0x1d5   : > { %v703_v9 = vpop.trf.xlu1 }
 0x1d6   : > { %899 = vst [vmem:[%s1197_s27 + $0x90] sm:$0xff] %v703_v9 }
 0x1d7   : > { %v754_v10 = vpop.trf.xlu2 }
 0x1d8   : > { %917 = vst [vmem:[%s1197_s27 + $0x120] sm:$0xff] %v754_v10 }
 0x1db   : > { %v656_v11 = vpop.trf.xlu0 }
 0x1dc   : > { %672 = vst [vmem:[%s1197_s27 + $0x18] sm:$0xff] %v656_v11 }
 0x1dd   : > { %v704_v12 = vpop.trf.xlu1 }
 0x1de   : > { %900 = vst [vmem:[%s1197_s27 + $0x98] sm:$0xff] %v704_v12 }
 0x1df   : > { %v755_v13 = vpop.trf.xlu2 }
 0x1e0   : > { %918 = vst [vmem:[%s1197_s27 + $0x128] sm:$0xff] %v755_v13 }
 0x1e3   : > { %v657_v14 = vpop.trf.xlu0 }
 0x1e4   : > { %673 = vst [vmem:[%s1197_s27 + $0x20] sm:$0xff] %v657_v14 }
 0x1e5   : > { %v705_v15 = vpop.trf.xlu1 }
 0x1e6   : > { %901 = vst [vmem:[%s1197_s27 + $0xa0] sm:$0xff] %v705_v15 }
 0x1e7   : > { %v756_v16 = vpop.trf.xlu2 }
 0x1e8   : > { %919 = vst [vmem:[%s1197_s27 + $0x130] sm:$0xff] %v756_v16 }
 0x1eb   : > { %v658_v17 = vpop.trf.xlu0 }
 0x1ec   : > { %674 = vst [vmem:[%s1197_s27 + $0x28] sm:$0xff] %v658_v17 }
 0x1ed   : > { %v706_v18 = vpop.trf.xlu1 }
 0x1ee   : > { %902 = vst [vmem:[%s1197_s27 + $0xa8] sm:$0xff] %v706_v18 }
 0x1ef   : > { %v757_v19 = vpop.trf.xlu2 }
 0x1f0   : > { %920 = vst [vmem:[%s1197_s27 + $0x138] sm:$0xff] %v757_v19 }
 0x1f3   : > { %v659_v20 = vpop.trf.xlu0 }
 0x1f4   : > { %675 = vst [vmem:[%s1197_s27 + $0x30] sm:$0xff] %v659_v20 }
 0x1f5   : > { %v707_v21 = vpop.trf.xlu1 }
 0x1f6   : > { %903 = vst [vmem:[%s1197_s27 + $0xb0] sm:$0xff] %v707_v21 }
 0x1f7   : > { %v758_v22 = vpop.trf.xlu2 }
 0x1f8   : > { %921 = vst [vmem:[%s1197_s27 + $0x140] sm:$0xff] %v758_v22 }
 0x1fb   : > { %v660_v23 = vpop.trf.xlu0 }
 0x1fc   : > { %676 = vst [vmem:[%s1197_s27 + $0x38] sm:$0xff] %v660_v23 }
 0x1fd   : > { %v708_v24 = vpop.trf.xlu1 }
 0x1fe   : > { %904 = vst [vmem:[%s1197_s27 + $0xb8] sm:$0xff] %v708_v24 }
 0x1ff   : > { %v759_v25 = vpop.trf.xlu2 }
 0x200   : > { %922 = vst [vmem:[%s1197_s27 + $0x148] sm:$0xff] %v759_v25 }
 0x203   : > { %v661_v26 = vpop.trf.xlu0 }
 0x204   : > { %677 = vst [vmem:[%s1197_s27 + $0x40] sm:$0xff] %v661_v26 }
 0x205   : > { %v709_v27 = vpop.trf.xlu1 }
 0x206   : > { %905 = vst [vmem:[%s1197_s27 + $0xc0] sm:$0xff] %v709_v27 }
 0x207   : > { %v760_v28 = vpop.trf.xlu2 }
 0x208   : > { %923 = vst [vmem:[%s1197_s27 + $0x150] sm:$0xff] %v760_v28 }
 0x20b   : > { %v662_v29 = vpop.trf.xlu0 }
 0x20c   : > { %678 = vst [vmem:[%s1197_s27 + $0x48] sm:$0xff] %v662_v29 }
 0x20d   : > { %v710_v30 = vpop.trf.xlu1 }
 0x20e   : > { %906 = vst [vmem:[%s1197_s27 + $0xc8] sm:$0xff] %v710_v30 }
 0x20f   : > { %v761_v31 = vpop.trf.xlu2 }
 0x210   : > { %924 = vst [vmem:[%s1197_s27 + $0x158] sm:$0xff] %v761_v31 }
 0x213   : > { %v663_v32 = vpop.trf.xlu0 }
 0x214   : > { %679 = vst [vmem:[%s1197_s27 + $0x50] sm:$0xff] %v663_v32 }
 0x215   : > { %v711_v33 = vpop.trf.xlu1 }
 0x216   : > { %907 = vst [vmem:[%s1197_s27 + $0xd0] sm:$0xff] %v711_v33 }
 0x217   : > { %v762_v34 = vpop.trf.xlu2 }
 0x218   : > { %925 = vst [vmem:[%s1197_s27 + $0x160] sm:$0xff] %v762_v34 }
 0x21b   : > { %v664_v35 = vpop.trf.xlu0 }
 0x21c   : > { %680 = vst [vmem:[%s1197_s27 + $0x58] sm:$0xff] %v664_v35 }
 0x21d   : > { %v712_v36 = vpop.trf.xlu1 }
 0x21e   : > { %908 = vst [vmem:[%s1197_s27 + $0xd8] sm:$0xff] %v712_v36 }
 0x21f   : > { %v763_v37 = vpop.trf.xlu2 }
 0x220   : > { %926 = vst [vmem:[%s1197_s27 + $0x168] sm:$0xff] %v763_v37 }
 0x223   : > { %v665_v38 = vpop.trf.xlu0 }
 0x224   : > { %681 = vst [vmem:[%s1197_s27 + $0x60] sm:$0xff] %v665_v38 }
 0x225   : > { %v713_v39 = vpop.trf.xlu1 }
 0x226   : > { %909 = vst [vmem:[%s1197_s27 + $0xe0] sm:$0xff] %v713_v39 }
 0x227   : > { %v764_v40 = vpop.trf.xlu2 }
 0x228   : > { %927 = vst [vmem:[%s1197_s27 + $0x170] sm:$0xff] %v764_v40 }
 0x22b   : > { %v666_v41 = vpop.trf.xlu0 }
 0x22c   : > { %682 = vst [vmem:[%s1197_s27 + $0x68] sm:$0xff] %v666_v41 }
 0x22d   : > { %v714_v42 = vpop.trf.xlu1 }
 0x22e   : > { %910 = vst [vmem:[%s1197_s27 + $0xe8] sm:$0xff] %v714_v42 }
 0x22f   : > { %v765_v43 = vpop.trf.xlu2 }
 0x230   : > { %928 = vst [vmem:[%s1197_s27 + $0x178] sm:$0xff] %v765_v43 }
 0x233   : > { %v667_v44 = vpop.trf.xlu0 }
 0x234   : > { %683 = vst [vmem:[%s1197_s27 + $0x70] sm:$0xff] %v667_v44 }
 0x235   : > { %v715_v45 = vpop.trf.xlu1 }
 0x236   : > { %911 = vst [vmem:[%s1197_s27 + $0xf0] sm:$0xff] %v715_v45 }
 0x23b   : > { %v668_v46 = vpop.trf.xlu0 }
 0x23c   : > { %684 = vst [vmem:[%s1197_s27 + $0x78] sm:$0xff] %v668_v46 }
 0x23d   : > { %v716_v47 = vpop.trf.xlu1 }
 0x23e   : > { %912 = vst [vmem:[%s1197_s27 + $0xf8] sm:$0xff] %v716_v47 }
 0x23f   : > { %1019 = shalt.err (!%p1016_p5)
}
 0x240   : > { %s1072_s22 = smov 128   ;;  %s1073_s23 = smov 8  }
 0x241   : > { %935 = dma.vmem_to_hbm [thread:$0]  (%p1124_p4), %s800_s3, 6144, %s802_s4, %s784_s5, %s1072_s22, %s1072_s22, %s1073_s23  }
 0x242 PF: > { %p941_p6 = scmp.ge.s32.totalorder %s1070_s11, 2  ;;  %s816_s24 = sand.u32 1, %s1050_s6  }
 0x243   : > { %s817_s25 = scalar_lea.sflag [#allocation4], %s816_s24 }
 0x244   : > { %p938_p7 = pnand %p941_p6, %p1131_p8 }
 0x246   : > { %p939_p9 = pneg %p938_p7 }
 0x248   : > { %1045 = dma.done.wait (%p939_p9), %s817_s25, 6144  }
 0x249   : > { %1047 = vsyncadd (%p939_p9), %s817_s25, 4294961152  ;;  %s14_s11 = sadd.s32 1, %s1070_s11   ;;  %s1290_s6 = smov %s1054_s7 }
 0x24a   : > { %p11_p10 = scmp.ge.s32.totalorder %s14_s11, 4   ;;  %s1291_s7 = smov %s1058_s8 }
 0x24b   : > { %s1292_s8 = smov %s1137_s19  ;;  %s1293_s9 = smov %s1066_s10 }
 0x24c   : > { %s1294_s10 = smov %s1296_s14  ;;  %13 = sbr.rel (!%p11_p10) target bundleno = 4 (0x4), region = 108 }
 0x251   :  { %823 = vsyncpa [#allocation4], 1 }
 0x252   :  { %825 = vsyncpa [#allocation4 + $0x1], 1 }

</bundles_post_ra>
